<compile_context>
chip_gen: v5e
topology: v5e:2x2
jax: 0.10.0
libtpu: 0.0.40
codegen_flags: <defaults>
</compile_context>

<pallas_src>
import functools

import jax
import jax.numpy as jnp
from jax.experimental import pallas as pl
from jax.experimental.pallas import tpu as pltpu


def _vmem():
    return pl.BlockSpec(memory_space=pltpu.MemorySpace.VMEM)


# ----------------------------------------------------------------------------
# Fused forward kernel:
#   h1   = relu(concat([x_dst0, A0 @ x]) @ [Ws0; Wn0] + b0)
#   gnn  = concat([h1_dst1, A1 @ h1]) @ [Ws1; Wn1] + b1
#   inner    = feat[row] * feat[col]                       (P, B, D)
#   fm       = relu((P*B, D) @ W_att + b_att)              reshaped (P, B, D)
#   logits   = sum_d gnn * fm                              (P, B, 1)
#   scores   = softmax over P (approx reciprocal, *P folded into normalizer)
#   attn_out = sum_P scores * inner                        (B, D)
#   out      = concat([gnn, attn_out]) @ W_fin + b_fin     (B, C_pad)
# ----------------------------------------------------------------------------
def sage_fused_kernel(a0_ref, a1_ref, x_ref, wp_ref, b_ref, feat_ref, o_ref, *,
                      dst0, dst1, in_feats, n_hidden, pairs, mxu_dtype):
    def mm(a, b):
        # operands already bf16 (pre-cast in wrapper / at intermediate
        # boundaries); f32 accumulation on the MXU.
        return jnp.dot(a, b, preferred_element_type=jnp.float32)

    k0 = 2 * in_feats
    k1 = 2 * n_hidden
    o_w0 = 0
    o_w1 = o_w0 + k0
    o_watt = o_w1 + k1
    o_wfin = o_watt + n_hidden

    # static slices into the packed weight / bias slabs
    w0 = wp_ref[pl.ds(o_w0, k0), pl.ds(0, n_hidden)]        # (2*F_in, H)
    w1 = wp_ref[pl.ds(o_w1, k1), pl.ds(0, n_hidden)]        # (2*H, H)
    w_att = wp_ref[pl.ds(o_watt, n_hidden), pl.ds(0, n_hidden)]
    w_fin = wp_ref[pl.ds(o_wfin, k1), :]                    # (2*H, C_pad)
    b0 = b_ref[pl.ds(0, 1), pl.ds(0, n_hidden)]
    b1 = b_ref[pl.ds(1, 1), pl.ds(0, n_hidden)]
    b_att = b_ref[pl.ds(2, 1), pl.ds(0, n_hidden)]
    b_fin = b_ref[pl.ds(3, 1), :]

    # ---- GraphSAGE layer 0: merged self+neigh matmul (+ ReLU; dropout=id) ----
    x_full = x_ref[...]                                     # (src0, F_in) bf16
    h_neigh0 = mm(a0_ref[...], x_full)                      # (dst0, F_in) f32
    cat0 = jnp.concatenate([x_full[:dst0], h_neigh0.astype(mxu_dtype)], axis=1)
    h1 = jnp.maximum(mm(cat0, w0) + b0, 0.0)                # (dst0, H) f32

    # ---- GraphSAGE layer 1 (no activation on last layer) ----
    h1_b = h1.astype(mxu_dtype)
    h_neigh1 = mm(a1_ref[...], h1_b)                        # (dst1, H) f32
    cat1 = jnp.concatenate([h1_b[:dst1], h_neigh1.astype(mxu_dtype)], axis=1)
    gnn = mm(cat1, w1) + b1                                 # (B, H) f32

    # ---- AFM head: vectorized over the pair axis ----
    n_pairs = len(pairs)
    # pair products built in-kernel from the (F, B, D) feature ref (f32 VPU)
    inner = jnp.stack([feat_ref[i] * feat_ref[j] for (i, j) in pairs], axis=0)
    inner_flat = inner.reshape(n_pairs * dst1, n_hidden)    # (P*B, D)
    fm_flat = jnp.maximum(mm(inner_flat.astype(mxu_dtype), w_att) + b_att, 0.0)
    fm = fm_flat.reshape(n_pairs, dst1, n_hidden)           # (P, B, D) f32

    # attention logits: broadcast multiply + lane reduce (no M=1 matmuls)
    logits = jnp.sum(gnn[None, :, :] * fm, axis=-1, keepdims=True)   # (P, B, 1)
    # numerically-stable softmax over the pair axis
    m = jnp.max(logits, axis=0, keepdims=True)                       # (1, B, 1)
    e = jnp.exp(logits - m)                                          # (P, B, 1)
    denom = jnp.sum(e, axis=0, keepdims=True)                        # (1, B, 1)
    # reciprocal on the EUP slot; fold the `* n_pairs` scale into the normalizer
    scale = pl.reciprocal(denom, approx=True) * float(n_pairs)
    attn_out = jnp.sum((e * scale) * inner, axis=0)                  # (B, D) f32

    # ---- final linear: merged K = 2*H, lane-dense 128-padded class output ----
    cat_f = jnp.concatenate(
        [gnn.astype(mxu_dtype), attn_out.astype(mxu_dtype)], axis=1)
    o_ref[...] = mm(cat_f, w_fin) + b_fin


def sage_forward(a0, a1, x, w_self0, w_neigh0, b0, w_self1, w_neigh1, b1,
                 feat_vec, w_att, b_att, w_fin, b_fin, *, n_classes,
                 mxu_dtype=jnp.bfloat16):
    dst0, _ = a0.shape
    dst1, _ = a1.shape
    in_feats = x.shape[1]
    n_hidden = w_self0.shape[1]
    bsz, num_fields, d = feat_vec.shape
    assert bsz == dst1 and d == n_hidden
    assert bsz % 8 == 0, "batch must be a multiple of 8 (f32 sublane tile)"

    # static pair indices (i < j) — baked into the kernel, no runtime gather
    pairs = tuple((i, j) for i in range(num_fields - 1)
                  for j in range(i + 1, num_fields))

    # lane-dense output: pad class dim to a multiple of 128 lanes
    c_pad = ((n_classes + 127) // 128) * 128

    # --- pack ALL weight matrices into one bf16 slab (fewer tiny DMAs) ---
    def pad_lanes(w):
        k, n = w.shape
        return jnp.zeros((k, c_pad), jnp.float32).at[:, :n].set(w)

    w0 = jnp.concatenate([w_self0, w_neigh0], axis=0)       # (2*F_in, H)
    w1 = jnp.concatenate([w_self1, w_neigh1], axis=0)       # (2*H, H)
    wpack = jnp.concatenate(
        [pad_lanes(w0), pad_lanes(w1), pad_lanes(w_att), pad_lanes(w_fin)],
        axis=0).astype(mxu_dtype)                           # (2F+2H+H+2H, c_pad)

    # --- pack all biases into one f32 slab ---
    bpack = jnp.zeros((4, c_pad), jnp.float32)
    bpack = bpack.at[0, :n_hidden].set(b0)
    bpack = bpack.at[1, :n_hidden].set(b1)
    bpack = bpack.at[2, :n_hidden].set(b_att)
    bpack = bpack.at[3, :n_classes].set(b_fin)

    # (B, F, D) -> (F, B, D): field on the leading axis so feat_ref[i] is a
    # contiguous (B, D) tile inside the kernel.
    # TODO(synk): fuse the embedding gather itself into the kernel via
    # PrefetchScalarGridSpec + pl.Element row-gather once B/D grow.
    feat_t = jnp.transpose(feat_vec, (1, 0, 2))

    kern = functools.partial(sage_fused_kernel, dst0=dst0, dst1=dst1,
                             in_feats=in_feats, n_hidden=n_hidden,
                             pairs=pairs, mxu_dtype=mxu_dtype)
    out_pad = pl.pallas_call(
        kern,
        out_shape=jax.ShapeDtypeStruct((bsz, c_pad), jnp.float32),
        in_specs=[_vmem()] * 6,
        out_specs=_vmem(),
    )(a0.astype(mxu_dtype), a1.astype(mxu_dtype), x.astype(mxu_dtype),
      wpack, bpack, feat_t)
    return out_pad[:, :n_classes]


# ----------------------------------------------------------------------------
# Pure-JAX reference (same math, exact softmax) for a correctness check.
# Matmul operands are cast to the same MXU dtype as the kernel so the check is
# apples-to-apples; the remaining delta is the approx reciprocal (~1e-3 rel).
# ----------------------------------------------------------------------------
def reference_forward(a0, a1, x, w_self0, w_neigh0, b0, w_self1, w_neigh1, b1,
                      emb, nz_idx, nz_val, w_att, b_att, w_fin, b_fin,
                      mxu_dtype=jnp.bfloat16):
    def mm(a, b):
        return jnp.dot(a.astype(mxu_dtype), b.astype(mxu_dtype),
                       preferred_element_type=jnp.float32)

    dst0, dst1 = a0.shape[0], a1.shape[0]
    h1 = jax.nn.relu(mm(x[:dst0], w_self0) + mm(mm(a0, x), w_neigh0) + b0)
    gnn = mm(h1[:dst1], w_self1) + mm(mm(a1, h1), w_neigh1) + b1

    feat = emb[nz_idx] * nz_val[..., None]                   # (B, F, D)
    nf = feat.shape[1]
    row = jnp.array([i for i in range(nf - 1) for j in range(i + 1, nf)])
    col = jnp.array([j for i in range(nf - 1) for j in range(i + 1, nf)])
    inner = feat[:, row] * feat[:, col]                      # (B, P, D)
    fm_pairs = jax.nn.relu(
        jnp.einsum('bpd,de->bpe', inner.astype(mxu_dtype),
                   w_att.astype(mxu_dtype),
                   preferred_element_type=jnp.float32) + b_att)
    logits = jnp.sum(gnn[:, None, :] * fm_pairs, axis=-1)    # (B, P)
    scores = jax.nn.softmax(logits, axis=1)
    attn_out = jnp.sum(scores[..., None] * inner, axis=1) * inner.shape[1]
    x_all = jnp.concatenate([gnn, attn_out], axis=1)
    return mm(x_all, w_fin) + b_fin


if __name__ == "__main__":
    in_feats, n_hidden, n_classes, n_layers = 16, 32, 8, 2
    num_fields = 4
    src0, dst0 = 32, 16   # layer-0 block: 32 src nodes -> 16 dst nodes
    src1, dst1 = 16, 8    # layer-1 block: 16 src nodes -> 8 dst nodes (= batch)
    batch = dst1

    key = jax.random.PRNGKey(0)
    ks = jax.random.split(key, 12)

    x = jax.random.normal(ks[0], (src0, in_feats), jnp.float32)

    # TODO(synk): DGL sampled graph blocks have no Pallas equivalent; modeled as
    # dense row-normalized adjacency matrices (mean aggregation = matmul).
    def make_block(k, ndst, nsrc):
        adj = (jax.random.uniform(k, (ndst, nsrc)) < 0.3).astype(jnp.float32)
        adj = adj.at[:, 0].set(1.0)  # ensure every dst node has >= 1 neighbor
        return adj / jnp.sum(adj, axis=1, keepdims=True)

    a0 = make_block(ks[1], dst0, src0)
    a1 = make_block(ks[2], dst1, src1)

    def init_linear(k, din, dout):
        kw, kb = jax.random.split(k)
        lim = 1.0 / jnp.sqrt(din)
        w = jax.random.uniform(kw, (din, dout), jnp.float32, -lim, lim)
        b = jax.random.uniform(kb, (dout,), jnp.float32, -lim, lim)
        return w, b

    w_self0, _ = init_linear(ks[3], in_feats, n_hidden)    # DGL fc_self: no bias
    w_neigh0, b0 = init_linear(ks[4], in_feats, n_hidden)
    w_self1, _ = init_linear(ks[5], n_hidden, n_hidden)
    w_neigh1, b1 = init_linear(ks[6], n_hidden, n_hidden)

    # FMLayer embedding table (in_feats + 1, n_hidden), padding_idx = 0
    emb = jax.random.normal(ks[7], (in_feats + 1, n_hidden), jnp.float32) * 0.1
    emb = emb.at[0].set(0.0)

    w_att, b_att = init_linear(ks[8], n_hidden, n_hidden)
    w_fin, b_fin = init_linear(ks[9], 2 * n_hidden, n_classes)

    nonzero_index = jax.random.randint(ks[10], (batch, num_fields), 1, in_feats + 1)
    nonzero_value = jax.random.uniform(ks[11], (batch, num_fields), jnp.float32)

    # ---- FM embedding lookup (glue: gather kept in plain JAX) ----
    # TODO(synk): embedding-table gather stays outside the kernel (no clean
    # dense-tile Pallas equivalent at this size).
    feat_vec = emb[nonzero_index] * nonzero_value[..., None]   # (B, F, D)

    # ---- Fused GraphSAGE + AFM head + final linear (single Pallas kernel) ----
    out = sage_forward(a0, a1, x, w_self0, w_neigh0, b0,
                       w_self1, w_neigh1, b1, feat_vec,
                       w_att, b_att, w_fin, b_fin, n_classes=n_classes)
    out = jax.block_until_ready(out)

    ref = reference_forward(a0, a1, x, w_self0, w_neigh0, b0,
                            w_self1, w_neigh1, b1, emb, nonzero_index,
                            nonzero_value, w_att, b_att, w_fin, b_fin)

    assert out.shape == (batch, n_classes)
    # tolerance covers bf16 matmul rounding + approx-reciprocal softmax (~1e-3)
    assert jnp.allclose(out, ref, atol=2e-2, rtol=2e-2), "mismatch vs reference"
    print("KERNEL_OK")
</pallas_src>

<mosaic_0001>
module attributes {stable_mosaic.version = 11 : i64} {
  func.func @sage_fused_kernel(%arg0: memref<16x32xbf16, #tpu.memory_space<vmem>>, %arg1: memref<8x16xbf16, #tpu.memory_space<vmem>>, %arg2: memref<32x16xbf16, #tpu.memory_space<vmem>>, %arg3: memref<192x128xbf16, #tpu.memory_space<vmem>>, %arg4: memref<4x128xf32, #tpu.memory_space<vmem>>, %arg5: memref<4x8x32xf32, #tpu.memory_space<vmem>>, %arg6: memref<8x128xf32, #tpu.memory_space<vmem>>) attributes {dimension_semantics = [], scalar_prefetch = 0 : i64, scratch_operands = 0 : i64, tpu.core_type = #tpu.core_type<tc>} {
    %c0 = arith.constant 0 : index
    %c0_0 = arith.constant 0 : index
    %0 = vector.load %arg3[%c0, %c0_0] : memref<192x128xbf16, #tpu.memory_space<vmem>>, vector<32x32xbf16>
    %c32 = arith.constant 32 : index
    %c0_1 = arith.constant 0 : index
    %1 = vector.load %arg3[%c32, %c0_1] : memref<192x128xbf16, #tpu.memory_space<vmem>>, vector<64x32xbf16>
    %c96 = arith.constant 96 : index
    %c0_2 = arith.constant 0 : index
    %2 = vector.load %arg3[%c96, %c0_2] : memref<192x128xbf16, #tpu.memory_space<vmem>>, vector<32x32xbf16>
    %c128 = arith.constant 128 : index
    %c0_3 = arith.constant 0 : index
    %3 = vector.load %arg3[%c128, %c0_3] : memref<192x128xbf16, #tpu.memory_space<vmem>>, vector<64x128xbf16>
    %c0_4 = arith.constant 0 : index
    %c0_5 = arith.constant 0 : index
    %4 = vector.load %arg4[%c0_4, %c0_5] : memref<4x128xf32, #tpu.memory_space<vmem>>, vector<1x32xf32>
    %c1 = arith.constant 1 : index
    %c0_6 = arith.constant 0 : index
    %5 = vector.load %arg4[%c1, %c0_6] : memref<4x128xf32, #tpu.memory_space<vmem>>, vector<1x32xf32>
    %c2 = arith.constant 2 : index
    %c0_7 = arith.constant 0 : index
    %6 = vector.load %arg4[%c2, %c0_7] : memref<4x128xf32, #tpu.memory_space<vmem>>, vector<1x32xf32>
    %c3 = arith.constant 3 : index
    %c0_8 = arith.constant 0 : index
    %7 = vector.load %arg4[%c3, %c0_8] : memref<4x128xf32, #tpu.memory_space<vmem>>, vector<1x128xf32>
    %c0_9 = arith.constant 0 : index
    %c0_10 = arith.constant 0 : index
    %8 = vector.load %arg2[%c0_9, %c0_10] : memref<32x16xbf16, #tpu.memory_space<vmem>>, vector<32x16xbf16>
    %c0_11 = arith.constant 0 : index
    %c0_12 = arith.constant 0 : index
    %9 = vector.load %arg0[%c0_11, %c0_12] : memref<16x32xbf16, #tpu.memory_space<vmem>>, vector<16x32xbf16>
    %cst = arith.constant dense<0.000000e+00> : vector<16x16xf32>
    %10 = tpu.matmul %9, %8, %cst {dimension_numbers = #tpu.dot_dimension_numbers<[1], [0], [0], [1], [0, 0, 1, 1], [], []>} : vector<16x32xbf16>, vector<32x16xbf16>, vector<16x16xf32> -> vector<16x16xf32>
    %11 = vector.extract_strided_slice %8 {offsets = [0, 0], sizes = [16, 16], strides = [1, 1]} : vector<32x16xbf16> to vector<16x16xbf16>
    %12 = arith.truncf %10 : vector<16x16xf32> to vector<16x16xbf16>
    %13 = tpu.concatenate %11, %12 in 1 : vector<16x16xbf16>, vector<16x16xbf16> -> vector<16x32xbf16>
    %cst_13 = arith.constant dense<0.000000e+00> : vector<16x32xf32>
    %14 = tpu.matmul %13, %0, %cst_13 {dimension_numbers = #tpu.dot_dimension_numbers<[1], [0], [0], [1], [0, 0, 1, 1], [], []>} : vector<16x32xbf16>, vector<32x32xbf16>, vector<16x32xf32> -> vector<16x32xf32>
    %15 = vector.broadcast %4 : vector<1x32xf32> to vector<16x32xf32>
    %16 = arith.addf %14, %15 : vector<16x32xf32>
    %cst_14 = arith.constant 0.000000e+00 : f32
    %17 = vector.broadcast %cst_14 : f32 to vector<16x32xf32>
    %18 = arith.maximumf %16, %17 : vector<16x32xf32>
    %19 = arith.truncf %18 : vector<16x32xf32> to vector<16x32xbf16>
    %c0_15 = arith.constant 0 : index
    %c0_16 = arith.constant 0 : index
    %20 = vector.load %arg1[%c0_15, %c0_16] : memref<8x16xbf16, #tpu.memory_space<vmem>>, vector<8x16xbf16>
    %cst_17 = arith.constant dense<0.000000e+00> : vector<8x32xf32>
    %21 = tpu.matmul %20, %19, %cst_17 {dimension_numbers = #tpu.dot_dimension_numbers<[1], [0], [0], [1], [0, 0, 1, 1], [], []>} : vector<8x16xbf16>, vector<16x32xbf16>, vector<8x32xf32> -> vector<8x32xf32>
    %22 = vector.extract_strided_slice %19 {offsets = [0, 0], sizes = [8, 32], strides = [1, 1]} : vector<16x32xbf16> to vector<8x32xbf16>
    %23 = arith.truncf %21 : vector<8x32xf32> to vector<8x32xbf16>
    %24 = tpu.concatenate %22, %23 in 1 : vector<8x32xbf16>, vector<8x32xbf16> -> vector<8x64xbf16>
    %cst_18 = arith.constant dense<0.000000e+00> : vector<8x32xf32>
    %25 = tpu.matmul %24, %1, %cst_18 {dimension_numbers = #tpu.dot_dimension_numbers<[1], [0], [0], [1], [0, 0, 1, 1], [], []>} : vector<8x64xbf16>, vector<64x32xbf16>, vector<8x32xf32> -> vector<8x32xf32>
    %26 = vector.broadcast %5 : vector<1x32xf32> to vector<8x32xf32>
    %27 = arith.addf %25, %26 : vector<8x32xf32>
    %c0_19 = arith.constant 0 : index
    %c0_20 = arith.constant 0 : index
    %c0_21 = arith.constant 0 : index
    %28 = vector.load %arg5[%c0_19, %c0_20, %c0_21] : memref<4x8x32xf32, #tpu.memory_space<vmem>>, vector<1x8x32xf32>
    %29 = vector.shape_cast %28 : vector<1x8x32xf32> to vector<8x32xf32>
    %c1_22 = arith.constant 1 : index
    %c0_23 = arith.constant 0 : index
    %c0_24 = arith.constant 0 : index
    %30 = vector.load %arg5[%c1_22, %c0_23, %c0_24] : memref<4x8x32xf32, #tpu.memory_space<vmem>>, vector<1x8x32xf32>
    %31 = vector.shape_cast %30 : vector<1x8x32xf32> to vector<8x32xf32>
    %32 = arith.mulf %29, %31 : vector<8x32xf32>
    %c0_25 = arith.constant 0 : index
    %c0_26 = arith.constant 0 : index
    %c0_27 = arith.constant 0 : index
    %33 = vector.load %arg5[%c0_25, %c0_26, %c0_27] : memref<4x8x32xf32, #tpu.memory_space<vmem>>, vector<1x8x32xf32>
    %34 = vector.shape_cast %33 : vector<1x8x32xf32> to vector<8x32xf32>
    %c2_28 = arith.constant 2 : index
    %c0_29 = arith.constant 0 : index
    %c0_30 = arith.constant 0 : index
    %35 = vector.load %arg5[%c2_28, %c0_29, %c0_30] : memref<4x8x32xf32, #tpu.memory_space<vmem>>, vector<1x8x32xf32>
    %36 = vector.shape_cast %35 : vector<1x8x32xf32> to vector<8x32xf32>
    %37 = arith.mulf %34, %36 : vector<8x32xf32>
    %c0_31 = arith.constant 0 : index
    %c0_32 = arith.constant 0 : index
    %c0_33 = arith.constant 0 : index
    %38 = vector.load %arg5[%c0_31, %c0_32, %c0_33] : memref<4x8x32xf32, #tpu.memory_space<vmem>>, vector<1x8x32xf32>
    %39 = vector.shape_cast %38 : vector<1x8x32xf32> to vector<8x32xf32>
    %c3_34 = arith.constant 3 : index
    %c0_35 = arith.constant 0 : index
    %c0_36 = arith.constant 0 : index
    %40 = vector.load %arg5[%c3_34, %c0_35, %c0_36] : memref<4x8x32xf32, #tpu.memory_space<vmem>>, vector<1x8x32xf32>
    %41 = vector.shape_cast %40 : vector<1x8x32xf32> to vector<8x32xf32>
    %42 = arith.mulf %39, %41 : vector<8x32xf32>
    %c1_37 = arith.constant 1 : index
    %c0_38 = arith.constant 0 : index
    %c0_39 = arith.constant 0 : index
    %43 = vector.load %arg5[%c1_37, %c0_38, %c0_39] : memref<4x8x32xf32, #tpu.memory_space<vmem>>, vector<1x8x32xf32>
    %44 = vector.shape_cast %43 : vector<1x8x32xf32> to vector<8x32xf32>
    %c2_40 = arith.constant 2 : index
    %c0_41 = arith.constant 0 : index
    %c0_42 = arith.constant 0 : index
    %45 = vector.load %arg5[%c2_40, %c0_41, %c0_42] : memref<4x8x32xf32, #tpu.memory_space<vmem>>, vector<1x8x32xf32>
    %46 = vector.shape_cast %45 : vector<1x8x32xf32> to vector<8x32xf32>
    %47 = arith.mulf %44, %46 : vector<8x32xf32>
    %c1_43 = arith.constant 1 : index
    %c0_44 = arith.constant 0 : index
    %c0_45 = arith.constant 0 : index
    %48 = vector.load %arg5[%c1_43, %c0_44, %c0_45] : memref<4x8x32xf32, #tpu.memory_space<vmem>>, vector<1x8x32xf32>
    %49 = vector.shape_cast %48 : vector<1x8x32xf32> to vector<8x32xf32>
    %c3_46 = arith.constant 3 : index
    %c0_47 = arith.constant 0 : index
    %c0_48 = arith.constant 0 : index
    %50 = vector.load %arg5[%c3_46, %c0_47, %c0_48] : memref<4x8x32xf32, #tpu.memory_space<vmem>>, vector<1x8x32xf32>
    %51 = vector.shape_cast %50 : vector<1x8x32xf32> to vector<8x32xf32>
    %52 = arith.mulf %49, %51 : vector<8x32xf32>
    %c2_49 = arith.constant 2 : index
    %c0_50 = arith.constant 0 : index
    %c0_51 = arith.constant 0 : index
    %53 = vector.load %arg5[%c2_49, %c0_50, %c0_51] : memref<4x8x32xf32, #tpu.memory_space<vmem>>, vector<1x8x32xf32>
    %54 = vector.shape_cast %53 : vector<1x8x32xf32> to vector<8x32xf32>
    %c3_52 = arith.constant 3 : index
    %c0_53 = arith.constant 0 : index
    %c0_54 = arith.constant 0 : index
    %55 = vector.load %arg5[%c3_52, %c0_53, %c0_54] : memref<4x8x32xf32, #tpu.memory_space<vmem>>, vector<1x8x32xf32>
    %56 = vector.shape_cast %55 : vector<1x8x32xf32> to vector<8x32xf32>
    %57 = arith.mulf %54, %56 : vector<8x32xf32>
    %58 = vector.shape_cast %32 : vector<8x32xf32> to vector<1x8x32xf32>
    %59 = vector.shape_cast %37 : vector<8x32xf32> to vector<1x8x32xf32>
    %60 = vector.shape_cast %42 : vector<8x32xf32> to vector<1x8x32xf32>
    %61 = vector.shape_cast %47 : vector<8x32xf32> to vector<1x8x32xf32>
    %62 = vector.shape_cast %52 : vector<8x32xf32> to vector<1x8x32xf32>
    %63 = vector.shape_cast %57 : vector<8x32xf32> to vector<1x8x32xf32>
    %64 = tpu.concatenate %58, %59, %60, %61, %62, %63 in 0 : vector<1x8x32xf32>, vector<1x8x32xf32>, vector<1x8x32xf32>, vector<1x8x32xf32>, vector<1x8x32xf32>, vector<1x8x32xf32> -> vector<6x8x32xf32>
    %65 = vector.shape_cast %64 : vector<6x8x32xf32> to vector<48x32xf32>
    %66 = arith.truncf %65 : vector<48x32xf32> to vector<48x32xbf16>
    %cst_55 = arith.constant dense<0.000000e+00> : vector<48x32xf32>
    %67 = tpu.matmul %66, %2, %cst_55 {dimension_numbers = #tpu.dot_dimension_numbers<[1], [0], [0], [1], [0, 0, 1, 1], [], []>} : vector<48x32xbf16>, vector<32x32xbf16>, vector<48x32xf32> -> vector<48x32xf32>
    %68 = vector.broadcast %6 : vector<1x32xf32> to vector<48x32xf32>
    %69 = arith.addf %67, %68 : vector<48x32xf32>
    %cst_56 = arith.constant 0.000000e+00 : f32
    %70 = vector.broadcast %cst_56 : f32 to vector<48x32xf32>
    %71 = arith.maximumf %69, %70 : vector<48x32xf32>
    %72 = vector.shape_cast %71 : vector<48x32xf32> to vector<6x8x32xf32>
    %73 = vector.shape_cast %27 : vector<8x32xf32> to vector<1x8x32xf32>
    %74 = vector.broadcast %73 : vector<1x8x32xf32> to vector<6x8x32xf32>
    %75 = arith.mulf %74, %72 : vector<6x8x32xf32>
    %cst_57 = arith.constant dense<0.000000e+00> : vector<6x8xf32>
    %76 = vector.multi_reduction <add>, %75, %cst_57 [2] : vector<6x8x32xf32> to vector<6x8xf32>
    %77 = vector.shape_cast %76 : vector<6x8xf32> to vector<6x8x1xf32>
    %cst_58 = arith.constant dense<0xFF800000> : vector<8x1xf32>
    %78 = vector.multi_reduction <maximumf>, %77, %cst_58 [0] : vector<6x8x1xf32> to vector<8x1xf32>
    %79 = vector.shape_cast %78 : vector<8x1xf32> to vector<1x8x1xf32>
    %80 = vector.broadcast %79 : vector<1x8x1xf32> to vector<6x8x1xf32>
    %81 = arith.subf %77, %80 : vector<6x8x1xf32>
    %82 = math.exp %81 : vector<6x8x1xf32>
    %cst_59 = arith.constant dense<0.000000e+00> : vector<8x1xf32>
    %83 = vector.multi_reduction <add>, %82, %cst_59 [0] : vector<6x8x1xf32> to vector<8x1xf32>
    %84 = vector.shape_cast %83 : vector<8x1xf32> to vector<1x8x1xf32>
    %85 = tpu.reciprocal %84 {approx = true} : vector<1x8x1xf32> -> vector<1x8x1xf32>
    %cst_60 = arith.constant 6.000000e+00 : f32
    %86 = vector.broadcast %cst_60 : f32 to vector<1x8x1xf32>
    %87 = arith.mulf %85, %86 : vector<1x8x1xf32>
    %88 = vector.broadcast %87 : vector<1x8x1xf32> to vector<6x8x1xf32>
    %89 = arith.mulf %82, %88 : vector<6x8x1xf32>
    %90 = vector.broadcast %89 : vector<6x8x1xf32> to vector<6x8x32xf32>
    %91 = arith.mulf %90, %64 : vector<6x8x32xf32>
    %cst_61 = arith.constant dense<0.000000e+00> : vector<8x32xf32>
    %92 = vector.multi_reduction <add>, %91, %cst_61 [0] : vector<6x8x32xf32> to vector<8x32xf32>
    %93 = arith.truncf %27 : vector<8x32xf32> to vector<8x32xbf16>
    %94 = arith.truncf %92 : vector<8x32xf32> to vector<8x32xbf16>
    %95 = tpu.concatenate %93, %94 in 1 : vector<8x32xbf16>, vector<8x32xbf16> -> vector<8x64xbf16>
    %cst_62 = arith.constant dense<0.000000e+00> : vector<8x128xf32>
    %96 = tpu.matmul %95, %3, %cst_62 {dimension_numbers = #tpu.dot_dimension_numbers<[1], [0], [0], [1], [0, 0, 1, 1], [], []>} : vector<8x64xbf16>, vector<64x128xbf16>, vector<8x128xf32> -> vector<8x128xf32>
    %97 = vector.broadcast %7 : vector<1x128xf32> to vector<8x128xf32>
    %98 = arith.addf %96, %97 : vector<8x128xf32>
    %c0_63 = arith.constant 0 : index
    %c0_64 = arith.constant 0 : index
    %99 = vector.load %arg6[%c0_63, %c0_64] : memref<8x128xf32, #tpu.memory_space<vmem>>, vector<8x128xf32>
    tpu.vector_store %arg6[%c0_63, %c0_64], %98 {strides = array<i32>} : memref<8x128xf32, #tpu.memory_space<vmem>>, vector<8x128xf32>,
    return
  }
}

</mosaic_0001>

<bundles_post_ra>
// kernel: tpu_custom_call.1
= control target key start
LH: loop header
LB: loop body
LE: loop exit
PB: predicated region body
PF: predicated region fallthrough
CT: control target
= control target key end

     0   :  { %11 = vsyncpa [#allocation3], 0  ;;  %s785_s0 = inlined_call_operand.vmem [shape: bf16[16,32], index: 0, kind: input, shape index: {}]   ;;  %s786_s1 = inlined_call_operand.vmem [shape: bf16[8,16], index: 1, kind: input, shape index: {}]   ;;  %s787_s2 = inlined_call_operand.vmem [shape: bf16[32,16], index: 2, kind: input, shape index: {}]   ;;  %s788_s3 = inlined_call_operand.hbm [shape: bf16[192,128], index: 3, kind: input, shape index: {}]   ;;  %s789_s4 = inlined_call_operand.vmem [shape: f32[4,128], index: 4, kind: input, shape index: {}]   ;;  %s790_s5 = inlined_call_operand.hbm [shape: f32[4,8,32], index: 5, kind: input, shape index: {}]   ;;  %s791_s6 = inlined_call_operand.hbm [shape: f32[8,128], index: 6, kind: output, shape index: {}]  }
   0x1   :  { %12 = vsyncpa [#allocation6], 0 }
   0x2   :  { %13 = vsyncpa [#allocation4], 0  ;;  %s24_s23 = sshll.u32 %s788_s3, 4  ;;  %s649_s24 = smov [#allocation2]   ;;  %s25_s23 = int_to_ptr.hbm [resolvable:$true] %s24_s23 }
   0x3   :  { %s26_s25 = sshll.u32 %s649_s24, 4  ;;  %s39_s28 = sshll.u32 %s790_s5, 4  ;;  %s27_s25 = int_to_ptr.vmem [resolvable:$true] %s26_s25  ;;  %s40_s28 = int_to_ptr.hbm [resolvable:$true] %s39_s28 }
   0x4   :  { %s650_s29 = smov 64   ;;  %s651_s30 = smov 4  }
   0x5   :  { %32 = dma.hbm_to_vmem [thread:$0]  %s25_s23, 1536, %s27_s25, [#allocation3], %s650_s29, %s650_s29, %s651_s30  }
   0x6   :  { %s652_s7 = smov [#allocation5]   ;;  %s653_s9 = smov 128  }
   0x7   :  { %s41_s8 = sshll.u32 %s652_s7, 4  ;;  %s654_s10 = smov 8   ;;  %s42_s8 = int_to_ptr.vmem [resolvable:$true] %s41_s8 }
   0x8   :  { %47 = dma.hbm_to_vmem [thread:$0]  %s40_s28, 512, %s42_s8, [#allocation6], %s653_s9, %s653_s9, %s654_s10  }
   0x9   :  { %643 = dma.done.wait [#allocation3], 1536  }
   0xa   :  { %644 = vsyncadd [#allocation3], 4294965760 }
   0xb   :  { %645 = dma.done.wait [#allocation6], 512  }
   0xc   :  { %646 = vsyncadd [#allocation6], 4294966784  ;;  %v540_v0 = vld [vmem:[%s787_s2 + $0x8] sm:$0xff]  ;;  %v539_v1 = vld [vmem:[%s787_s2] sm:$0xff]  ;;  %vm108_vm0 = vcmask 261120   ;;  %s655_s2 = smov 16  }
   0xd   :  { %118 = vmatpush.bf16.msra.mxu0 %v540_v0  ;;  %v541_v2 = vld [vmem:[%s785_s0] sm:$0xff]  ;;  %v528_v3 = vld [vmem:[#allocation2 + $0x8] sm:$0xff]  ;;  %vm135_vm1 = vcmask 130048   ;;  %v534_v27 = vld [vmem:[#allocation2 + $0x38] sm:$0xff]  ;;  %vm229_vm2 = vcmask 523264   ;;  %s657_s24 = smov [#allocation7]  }
   0xe   :  { %160 = vmatpush.bf16.msra.mxu1 %v528_v3  ;;  %v527_v4 = vld [vmem:[#allocation2] sm:$0xff]  ;;  %v247_v29 = vld [vmem:[#allocation5 + $0x8] sm:$0xff]  ;;  %v250_v30 = vld [vmem:[#allocation5 + $0x10] sm:$0xff]  ;;  %542 = vmatpush.bf16.msra.mxu2 %v534_v27  ;;  %s446_s25 = sshll.u32 %s657_s24, 4  ;;  %s448_s28 = sshll.u32 %s791_s6, 4  ;;  %s447_s25 = int_to_ptr.vmem [resolvable:$true] %s446_s25  ;;  %s449_s28 = int_to_ptr.hbm [resolvable:$true] %s448_s28 }
   0xf   :  { %v553_v14 = vld [vmem:[%s789_s4] ss:$0 sm:$0xff]  ;;  %v253_v31 = vld [vmem:[#allocation5 + $0x18] sm:$0xff]  ;;  %v533_v32 = vld [vmem:[#allocation2 + $0x30] sm:$0xff]  ;;  %v720_v34 = vmul.f32 %v250_v30, %v247_v29 }
  0x10   :  { %v172_v26 = vld [vmem:[%s786_s1] sm:$0xf]  ;;  %v532_v35 = vld [vmem:[#allocation2 + $0x28] sm:$0xff]  ;;  %v530_v41 = vld [vmem:[#allocation2 + $0x18] sm:$0xff]  ;;  %v732_v43 = vmul.f32 %v253_v31, %v247_v29  ;;  %v734_v44 = vmul.f32 %v253_v31, %v250_v30  ;;  %s656_s1 = smov 32  }
  0x11   :  { %119 = vmatpush.bf16.msra.mxu0 %v539_v1  ;;  %v245_v28 = vld [vmem:[#allocation5] sm:$0xff]  ;;  %v529_v42 = vld [vmem:[#allocation2 + $0x10] sm:$0xff] }
  0x12   :  { %161 = vmatpush.bf16.msra.mxu1 %v527_v4  ;;  %v718_v33 = vmul.f32 %v253_v31, %v245_v28  ;;  %v722_v36 = vmul.f32 %v247_v29, %v245_v28  ;;  %v724_v37 = vmul.f32 %v250_v30, %v245_v28  ;;  %v531_v38 = vld [vmem:[#allocation2 + $0x20] sm:$0xff]  ;;  %543 = vmatpush.bf16.msra.mxu2 %v533_v32 }
  0x13   :  { %v260_v45 = vpack.c.bf16 %v734_v44, %v732_v43  ;;  %v554_v57 = vld [vmem:[%s789_s4 + $0x2] ss:$0 sm:$0xff]  ;;  %v555_v61 = vld [vmem:[%s789_s4 + $0x1] ss:$0 sm:$0xff] }
  0x14   :  { %471 = vmatmul.msk.bf16.vlgmr.msra.gmra.mxu0 %vm108_vm0, %v541_v2  ;;  %v259_v39 = vpack.c.bf16 %v720_v34, %v718_v33  ;;  %v258_v40 = vpack.c.bf16 %v724_v37, %v722_v36 }
  0x16   :  { %289 = vmatpush.bf16.msrb.mxu1 %v534_v27  ;;  %508 = vmatmul.msk.bf16.vlgmr.msra.gmra.mxu2 %vm108_vm0, %v259_v39 }
  0x1a   :  { %290 = vmatpush.bf16.msrb.mxu1 %v533_v32 }
  0x26   :  { %509 = vmatmul.msk.bf16.gmra.mxu2 %vm108_vm0, %v260_v45 }
  0x91   :  { %v121_v5 = vpop.f32.mrf.mxu0 }
  0x92   :  { %v126_v6 = vpack.c.bf16 %v121_v5, %v121_v5 }
  0x94   :  { %v130_v9 = vunpack.c.l.b16 %v126_v6 }
  0x99   :  { %v123_v7 = vpop.f32.mrf.mxu0  ;;  %v297_v53 = vpop.f32.mrf.mxu2 }
  0x9a   :  { %v127_v8 = vpack.c.bf16 %v123_v7, %v123_v7  ;;  %v298_v60 = vadd.f32 %v554_v57, %v297_v53 }
  0x9c   :  { %v131_v10 = vunpack.c.l.b16 %v127_v8  ;;  %v309_v3 = vmax.f32 %v298_v60, 0.0 }
  0x9e   :  { %v132_v11 = vpack.c.b16 %v131_v10, %v130_v9 }
  0xa0   :  { %133 = vrot.lane.b32.xlu0 %v132_v11, %s655_s2 }
  0xa1   :  { %v299_v54 = vpop.f32.mrf.mxu2 }
  0xa9   :  { %v302_v55 = vpop.f32.mrf.mxu2 }
  0xaa   :  { %v303_v59 = vadd.f32 %v554_v57, %v302_v55 }
  0xac   :  { %v311_v0 = vmax.f32 %v303_v59, 0.0 }
  0xb1   :  { %v304_v62 = vpop.f32.mrf.mxu2 }
  0xb2   :  { %v305_v4 = vadd.f32 %v554_v57, %v304_v62 }
  0xb4   :  { %v312_v10 = vmax.f32 %v305_v4, 0.0 }
 0x112   :  { %v134_v12 = vpop.permute.xlu0 %133 }
 0x113   :  { %v138_v13 = vsel %vm135_vm1, %v539_v1, %v134_v12 }
 0x114   :  { %480 = vmatmul.msk.bf16.vlgmr.msra.gmra.mxu1 %vm108_vm0, %v138_v13 }
 0x124   :  { %507 = vmatmul.msk.bf16.vlgmr.msrb.gmra.mxu1 %vm108_vm0, %v258_v40 }
 0x191   :  { %v163_v15 = vpop.f32.mrf.mxu1 }
 0x192   :  { %v164_v16 = vadd.f32 %v553_v14, %v163_v15 }
 0x194   :  { %v168_v17 = vmax.f32 %v164_v16, 0.0 }
 0x196   :  { %v170_v20 = vpack.c.bf16 %v168_v17, %v168_v17 }
 0x198   :  { %v175_v23 = vunpack.c.l.b16 %v170_v20 }
 0x199   :  { %v165_v18 = vpop.f32.mrf.mxu1 }
 0x19a   :  { %v166_v19 = vadd.f32 %v553_v14, %v165_v18  ;;  %v300_v18 = vadd.f32 %v554_v57, %v299_v54 }
 0x19c   :  { %v169_v21 = vmax.f32 %v166_v19, 0.0 }
 0x19e   :  { %v171_v22 = vpack.c.bf16 %v169_v21, %v169_v21  ;;  %v310_v21 = vmax.f32 %v300_v18, 0.0 }
 0x1a0   :  { %v176_v24 = vunpack.c.l.b16 %v171_v22 }
 0x1a1   :  { %v292_v56 = vpop.f32.mrf.mxu1 }
 0x1a2   :  { %v177_v25 = vpack.c.b16 %v176_v24, %v175_v23  ;;  %v293_v58 = vadd.f32 %v554_v57, %v292_v56 }
 0x1a4   :  { %189 = vmatpush.bf16.msra.mxu3 %v177_v25  ;;  %v307_v63 = vmax.f32 %v293_v58, 0.0 }
 0x1a7   :  { %481 = vmatmul.msk.bf16.vlgmr.msra.gmra.mxu3 %vm135_vm1, %v172_v26 }
 0x1a8   :  { %236 = vmatpush.bf16.msrb.mxu3 %v532_v35 }
 0x1a9   :  { %v294_v1 = vpop.f32.mrf.mxu1 }
 0x1aa   :  { %v295_v6 = vadd.f32 %v554_v57, %v294_v1  ;;  %v537_v1 = vld [vmem:[#allocation2 + $0x50] sm:$0xff] }
 0x1ac   :  { %237 = vmatpush.bf16.msrb.mxu3 %v531_v38  ;;  %v308_v14 = vmax.f32 %v295_v6, 0.0  ;;  %v535_v6 = vld [vmem:[#allocation2 + $0x40] sm:$0xff] }
 0x1b0   :  { %238 = vmatpush.bf16.msrb.mxu3 %v530_v41 }
 0x1b4   :  { %239 = vmatpush.bf16.msrb.mxu3 %v529_v42 }
 0x22a   :  { %v191_v46 = vpop.f32.mrf.mxu3 }
 0x22b   :  { %v195_v47 = vpack.c.bf16 %v191_v46, %v191_v46 }
 0x22d   :  { %v197_v48 = vunpack.c.l.b16 %v195_v47 }
 0x22f   :  { %v198_v49 = vpack.c.b16 %v197_v48, %v197_v48 }
 0x231   :  { %199 = vrot.lane.b32.xlu0 %v198_v49, %s656_s1 }
 0x232   :  { %v193_v50 = vpop.f32.mrf.mxu3 }
 0x2a3   :  { %v200_v51 = vpop.permute.xlu0 %199 }
 0x2a4   :  { %v203_v52 = vsel %vm108_vm0, %v170_v20, %v200_v51 }
 0x2a5   :  { %498 = vmatmul.msk.bf16.vlgmr.msrb.gmra.mxu3 %vm229_vm2, %v203_v52 }
 0x328   :  { %v241_v2 = vpop.f32.mrf.mxu3 }
 0x329   :  { %v748_v5 = vadd.f32 %v555_v61, %v241_v2  ;;  %v536_v2 = vld [vmem:[#allocation2 + $0x48] sm:$0xff] }
 0x32b   :  { %v317_v7 = vmul.f32 %v311_v0, %v748_v5  ;;  %v315_v8 = vmul.f32 %v309_v3, %v748_v5  ;;  %v313_v9 = vmul.f32 %v307_v63, %v748_v5  ;;  %v318_v16 = vmul.f32 %v312_v10, %v748_v5  ;;  %v538_v0 = vld [vmem:[#allocation2 + $0x58] sm:$0xff] }
 0x32c   :  { %v314_v17 = vmul.f32 %v308_v14, %v748_v5  ;;  %v316_v22 = vmul.f32 %v310_v21, %v748_v5  ;;  %431 = vmatpush.bf16.msrb.mxu0 %v538_v0 }
 0x32d   :  { %v331_v11 = vsel %vm108_vm0, %v317_v7, 0.0  ;;  %v325_v12 = vsel %vm108_vm0, %v315_v8, 0.0  ;;  %v319_v13 = vsel %vm108_vm0, %v313_v9, 0.0  ;;  %v334_v19 = vsel %vm108_vm0, %v318_v16, 0.0 }
 0x32e   :  { %332 = vadd.xlane.f32.xlu2 %v331_v11  ;;  %326 = vadd.xlane.f32.xlu0 %v325_v12  ;;  %v322_v20 = vsel %vm108_vm0, %v314_v17, 0.0  ;;  %v328_v23 = vsel %vm108_vm0, %v316_v22, 0.0 }
 0x32f   :  { %320 = vadd.xlane.f32.xlu1 %v319_v13 }
 0x330   :  { %v243_v15 = vpop.f32.mrf.mxu3  ;;  %432 = vmatpush.bf16.msrb.mxu0 %v537_v1 }
 0x334   :  { %433 = vmatpush.bf16.msrb.mxu0 %v536_v2 }
 0x336   :  { %335 = vadd.xlane.f32.xlu2 %v334_v19 }
 0x337   :  { %323 = vadd.xlane.f32.xlu1 %v322_v20 }
 0x338   :  { %434 = vmatpush.bf16.msrb.mxu0 %v535_v6 }
 0x33f   :  { %329 = vadd.xlane.f32.xlu1 %v328_v23 }
 0x3a1   :  { %v333_v24 = vpop.xlane.xlu2 %332  ;;  %v327_v30 = vpop.xlane.xlu0 %326 }
 0x3a2   :  { %v321_v25 = vpop.xlane.xlu1 %320 }
 0x3a3   :  { %v337_v29 = vmax.f32 %v321_v25, %v333_v24 }
 0x3a9   :  { %v336_v27 = vpop.xlane.xlu2 %335 }
 0x3aa   :  { %v324_v26 = vpop.xlane.xlu1 %323 }
 0x3ab   :  { %v338_v28 = vmax.f32 %v324_v26, %v336_v27 }
 0x3ad   :  { %v339_v32 = vmax.f32 %v337_v29, %v338_v28 }
 0x3b2   :  { %v330_v31 = vpop.xlane.xlu1 %329 }
 0x3b3   :  { %v340_v35 = vmax.f32 %v327_v30, %v330_v31 }
 0x3b5   :  { %v341_v38 = vmax.f32 %v339_v32, %v340_v35 }
 0x3b7   :  { %v342_v39 = vsub.f32 %v321_v25, %v341_v38  ;;  %v343_v40 = vsub.f32 %v324_v26, %v341_v38  ;;  %v344_v41 = vsub.f32 %v327_v30, %v341_v38  ;;  %v345_v42 = vsub.f32 %v330_v31, %v341_v38  ;;  %v556_v30 = vld [vmem:[%s789_s4 + $0x3] ss:$0 sm:$0xff] }
 0x3b8   :  { %v346_v47 = vsub.f32 %v333_v24, %v341_v38  ;;  %v347_v49 = vsub.f32 %v336_v27, %v341_v38 }
 0x3b9   :  { %v348_v45 = vmul.f32 1.442695, %v342_v39  ;;  %v350_v46 = vmul.f32 1.442695, %v343_v40  ;;  %v352_v48 = vmul.f32 1.442695, %v344_v41 }
 0x3ba   :  { %v354_v50 = vmul.f32 1.442695, %v345_v42  ;;  %v356_v51 = vmul.f32 1.442695, %v346_v47  ;;  %v358_v52 = vmul.f32 1.442695, %v347_v49 }
 0x3bb   :  { %557 = vpow2.f32 %v348_v45 }
 0x3bc   :  { %559 = vpow2.f32 %v350_v46 }
 0x3bd   :  { %561 = vpow2.f32 %v352_v48 }
 0x3be   :  { %563 = vpow2.f32 %v354_v50 }
 0x3bf   :  { %565 = vpow2.f32 %v356_v51 }
 0x3c0   :  { %567 = vpow2.f32 %v358_v52 }
 0x3c1   :  { %v558_v53 = vpop.eup %557 }
 0x3c2   :  { %v560_v54 = vpop.eup %559 }
 0x3c3   :  { %v360_v55 = vadd.f32 %v560_v54, %v558_v53  ;;  %v562_v56 = vpop.eup %561 }
 0x3c4   :  { %v564_v58 = vpop.eup %563 }
 0x3c5   :  { %v361_v57 = vadd.f32 %v562_v56, %v360_v55  ;;  %v566_v60 = vpop.eup %565 }
 0x3c6   :  { %v568_v62 = vpop.eup %567 }
 0x3c7   :  { %v362_v59 = vadd.f32 %v564_v58, %v361_v57 }
 0x3c9   :  { %v363_v61 = vadd.f32 %v566_v60, %v362_v59 }
 0x3cb   :  { %v364_v63 = vadd.f32 %v568_v62, %v363_v61 }
 0x3cd   :  { %569 = vrcp.f32 %v364_v63 }
 0x3d3   :  { %v570_v3 = vpop.eup %569 }
 0x3d4   :  { %v366_v4 = vmul.f32 6.0, %v570_v3 }
 0x3d6   :  { %v370_v7 = vmul.f32 %v564_v58, %v366_v4  ;;  %v367_v8 = vmul.f32 %v558_v53, %v366_v4  ;;  %v368_v9 = vmul.f32 %v560_v54, %v366_v4  ;;  %v369_v10 = vmul.f32 %v562_v56, %v366_v4 }
 0x3d7   :  { %v371_v11 = vmul.f32 %v566_v60, %v366_v4  ;;  %v372_v16 = vmul.f32 %v568_v62, %v366_v4 }
 0x3d8   :  { %v373_v12 = vmul.f32 %v367_v8, %v722_v36  ;;  %v374_v13 = vmul.f32 %v368_v9, %v724_v37  ;;  %v375_v14 = vmul.f32 %v369_v10, %v718_v33  ;;  %v376_v15 = vmul.f32 %v370_v7, %v720_v34 }
 0x3d9   :  { %v377_v20 = vmul.f32 %v371_v11, %v732_v43  ;;  %v378_v36 = vmul.f32 %v372_v16, %v734_v44  ;;  %v390_v43 = vpack.c.bf16 %v748_v5, %v748_v5 }
 0x3da   :  { %v379_v17 = vsel %vm108_vm0, %v373_v12, 0.0  ;;  %v380_v18 = vsel %vm108_vm0, %v374_v13, 0.0  ;;  %v382_v21 = vsel %vm108_vm0, %v375_v14, 0.0  ;;  %v384_v37 = vsel %vm108_vm0, %v376_v15, 0.0 }
 0x3db   :  { %v381_v19 = vadd.f32 %v380_v18, %v379_v17  ;;  %v386_v33 = vsel %vm108_vm0, %v377_v20, 0.0  ;;  %v388_v34 = vsel %vm108_vm0, %v378_v36, 0.0 }
 0x3dd   :  { %v383_v22 = vadd.f32 %v382_v21, %v381_v19 }
 0x3df   :  { %v385_v23 = vadd.f32 %v384_v37, %v383_v22 }
 0x3e1   :  { %v387_v24 = vadd.f32 %v386_v33, %v385_v23 }
 0x3e3   :  { %v389_v25 = vadd.f32 %v388_v34, %v387_v24 }
 0x3e5   :  { %v391_v26 = vpack.c.bf16 %v389_v25, %v389_v25 }
 0x3e7   :  { %v393_v27 = vunpack.c.l.b16 %v391_v26 }
 0x3e9   :  { %v394_v28 = vpack.c.b16 %v393_v27, %v393_v27 }
 0x3eb   :  { %395 = vrot.lane.b32.xlu2 %v394_v28, %s656_s1 }
 0x445   :  { %v396_v29 = vpop.permute.xlu2 %395 }
 0x446   :  { %v399_v44 = vsel %vm108_vm0, %v390_v43, %v396_v29 }
 0x447   :  { %526 = vmatmul.msk.bf16.vlgmr.msrb.gmra.mxu0 %vm229_vm2, %v399_v44 }
 0x4c4   :  { %v436_v31 = vpop.f32.mrf.mxu0 }
 0x4c5   :  { %v437_v32 = vadd.f32 %v556_v30, %v436_v31 }
 0x4c7   :  { %440 = vst [vmem:[#allocation7] sm:$0xff] %v437_v32 }
 0x4c8   :  { %451 = dma.vmem_to_hbm [thread:$0]  %s447_s25, 128, %s449_s28, [#allocation4]  }
 0x4cc   :  { %v438_v5 = vpop.f32.mrf.mxu0 }
 0x4cd   :  { %647 = dma.done.wait [#allocation4], 128  }
 0x4ce   :  { %648 = vsyncadd [#allocation4], 4294967168 }
 0x4cf   :  { %456 = vsyncpa [#allocation3], 1 }
 0x4d0   :  { %457 = vsyncpa [#allocation6], 1 }
 0x4d1   :  { %458 = vsyncpa [#allocation4], 1 }

</bundles_post_ra>
